<compile_context>
chip_gen: v7x
topology: tpu7x:2x2x1
jax: 0.10.0
libtpu: 0.0.40
codegen_flags: <defaults>
</compile_context>

<pallas_src>
import functools

import jax
import jax.numpy as jnp
from jax.experimental import pallas as pl
from jax.experimental.pallas import tpu as pltpu


# ----------------------------- fused kernel ---------------------------------

def _disc_stack_kernel(x_ref, *refs, layer_cfgs, T_in, slope, mxu_min_cin):
    """Fused ConvNet discriminator stack for one batch element (grid = batch).

    Ref layout (all float32):
      x_ref         : (1, C_in0, T_in)                     raw input block
      refs[0:L]     : w2d_l  (C_out_l, K_l*C_in_l)         im2col weights
      refs[L:2L]    : b_l    (C_out_l, 1)                  biases
      refs[2L:3L]   : o_l    (1, C_out_l, T_out_l)         NCW feature outputs
      refs[3L:3L+2] : ping-pong activation scratch (C_max, Tp_max)
      refs[3L+2]    : im2col scratch (depth_max, Tfull_max)
    """
    L = len(layer_cfgs)
    w_refs = refs[0:L]
    b_refs = refs[L:2 * L]
    o_refs = refs[2 * L:3 * L]
    act_bufs = (refs[3 * L], refs[3 * L + 1])
    cols = refs[3 * L + 2]

    # Stage the raw input into a zero-filled buffer so the conv padding
    # margins are implicit (no wrapper-side pad / reshape / transpose).
    C_in0, _, _, _, p0 = layer_cfgs[0]
    act_bufs[0][...] = jnp.zeros_like(act_bufs[0])
    act_bufs[0][0:C_in0, p0:p0 + T_in] = x_ref[0]

    T_cur = T_in
    for l, (C_in, C_out, K, s, p) in enumerate(layer_cfgs):
        src = act_bufs[l % 2]              # padded input of this layer
        T_pad = T_cur + 2 * p
        T_full = T_pad - K + 1             # stride-1 output length
        T_out = (T_pad - K) // s + 1       # strided output length
        depth = K * C_in
        is_last = (l == L - 1)

        w = w_refs[l][...]                 # (C_out, depth)
        bias = b_refs[l][...]              # (C_out, 1)

        if C_in >= mxu_min_cin:
            # --- MXU path: im2col via static-offset scratch writes ---------
            # Every load is a contiguous lane slice; sublane offsets k*C_in
            # are multiples of 8 (C_in >= 8), so the stores are aligned.
            # One matmul per layer with contraction depth K*C_in.
            for k in range(K):
                cols[k * C_in:(k + 1) * C_in, 0:T_full] = (
                    src[0:C_in, k:k + T_full])
            z = jnp.dot(w, cols[0:depth, 0:T_full],
                        preferred_element_type=jnp.float32)     # (C_out, T_full)
        else:
            # --- VPU path (shallow contraction, e.g. C_in == 1) ------------
            # Per-tap broadcast multiply-add straight from the contiguous
            # tap slices of `src`; nothing is materialized through the XLU.
            # (With >=512-lane time tiles these could also go to the MXU.)
            z = jnp.zeros((C_out, T_full), jnp.float32)
            for k in range(K):
                for ci in range(C_in):
                    j = k * C_in + ci
                    z = z + w[:, j:j + 1] * src[ci:ci + 1, k:k + T_full]

        if s > 1:
            # Exact lane downsample via a 0/1 selection matmul: keeps every
            # access contiguous at the cost of one extra (cheap) MXU op.
            rows = jax.lax.broadcasted_iota(jnp.int32, (T_full, T_out), 0)
            colz = jax.lax.broadcasted_iota(jnp.int32, (T_full, T_out), 1)
            sel = (rows == s * colz).astype(jnp.float32)
            z = jnp.dot(z, sel, preferred_element_type=jnp.float32)  # (C_out, T_out)

        y = z + bias
        if not is_last:
            y = jnp.where(y >= 0, y, slope * y)      # LeakyReLU(slope)

        o_refs[l][0] = y.astype(o_refs[l].dtype)     # NCW feature, written once

        if not is_last:
            # Stage the (zero-padded) activation for the next layer; the
            # intermediate feature map never leaves VMEM.
            p_next = layer_cfgs[l + 1][4]
            dst = act_bufs[(l + 1) % 2]
            dst[...] = jnp.zeros_like(dst)
            dst[0:C_out, p_next:p_next + T_out] = y

        T_cur = T_out


# ----------------------------- wrapper ---------------------------------------

def conv_stack_forward(params, x, slope=0.2, mxu_min_cin=8):
    """Fused forward of one ConvNet discriminator stack.

    x: (B, C_in0, T) float32.  Returns the list of intermediate feature maps
    (NCW), with LeakyReLU on every layer except the final score layer, exactly
    like the per-layer reference.  All layers run inside a single pallas_call;
    only the feature maps touch HBM.
    """
    B, C_in0, T = x.shape
    L = len(params)
    assert L >= 1

    # Static per-layer geometry + scratch sizing.
    layer_cfgs = []
    out_dims = []
    c_max, tp_max = C_in0, 1
    depth_max, tfull_max = 8, 128
    t_cur, c_cur = T, C_in0
    for lp in params:
        c_out, c_in, k = lp["w"].shape
        s, p = lp["stride"], lp["padding"]
        assert c_in == c_cur, "channel mismatch in discriminator stack"
        t_pad = t_cur + 2 * p
        t_full = t_pad - k + 1
        t_out = (t_pad - k) // s + 1
        assert t_full >= 1 and t_out >= 1, "layer collapses the time axis"
        layer_cfgs.append((c_in, c_out, k, s, p))
        out_dims.append((c_out, t_out))
        c_max = max(c_max, c_in, c_out)
        tp_max = max(tp_max, t_pad)
        if c_in >= mxu_min_cin:
            depth_max = max(depth_max, k * c_in)
            tfull_max = max(tfull_max, t_full)
        t_cur, c_cur = t_out, c_out

    # Inputs: raw x block per batch element, then pre-flattened weights/biases.
    in_specs = [pl.BlockSpec((1, C_in0, T), lambda b: (b, 0, 0))]
    call_args = [x]
    for lp in params:
        in_specs.append(pl.BlockSpec(lp["w2d"].shape, lambda b: (0, 0)))
        call_args.append(lp["w2d"])
    for lp in params:
        in_specs.append(pl.BlockSpec(lp["b2"].shape, lambda b: (0, 0)))
        call_args.append(lp["b2"])

    out_shape = tuple(jax.ShapeDtypeStruct((B, co, to), x.dtype)
                      for (co, to) in out_dims)
    out_specs = tuple(pl.BlockSpec((1, co, to), lambda b: (b, 0, 0))
                      for (co, to) in out_dims)

    scratch_shapes = [
        pltpu.VMEM((c_max, tp_max), jnp.float32),     # activation ping
        pltpu.VMEM((c_max, tp_max), jnp.float32),     # activation pong
        pltpu.VMEM((depth_max, tfull_max), jnp.float32),  # im2col scratch
    ]

    kernel = functools.partial(
        _disc_stack_kernel, layer_cfgs=tuple(layer_cfgs), T_in=T,
        slope=slope, mxu_min_cin=mxu_min_cin)

    feats = pl.pallas_call(
        kernel,
        out_shape=out_shape,
        grid=(B,),
        in_specs=in_specs,
        out_specs=out_specs,
        scratch_shapes=scratch_shapes,
        compiler_params=pltpu.CompilerParams(
            dimension_semantics=("parallel",)),   # v7x: split batch across TCs
    )(*call_args)
    return list(feats)


# ---------------- parameter construction (weights pre-flattened) -------------

def _init_conv_params(key, c_in, c_out, k):
    wk, bk = jax.random.split(key)
    w = 0.1 * jax.random.normal(wk, (c_out, c_in, k), jnp.float32)
    b = 0.01 * jax.random.normal(bk, (c_out,), jnp.float32)
    return w, b


def make_conv_stack_discriminator(key, n_channels, layer_cfg):
    """layer_cfg: list of (c_out, kernel_size, stride, padding)."""
    params = []
    c_in = n_channels
    keys = jax.random.split(key, len(layer_cfg))
    for kk, (c_out, k, s, p) in zip(keys, layer_cfg):
        w, b = _init_conv_params(kk, c_in, c_out, k)
        params.append(dict(
            w=w, b=b, stride=s, padding=p,
            # Lane-dense im2col weights and (C_out, 1) bias, built ONCE at
            # construction time (no per-forward XLA transpose): column
            # k*C_in + ci  <->  w[:, ci, k].
            w2d=jnp.transpose(w, (0, 2, 1)).reshape(c_out, k * c_in),
            b2=b.reshape(c_out, 1)))
        c_in = c_out
    return params


def conv_stack_reference(params, x, slope=0.2):
    """Pure-JAX reference (lax conv) for numerical validation."""
    features = []
    h = x
    n = len(params)
    for i, lp in enumerate(params):
        y = jax.lax.conv_general_dilated(
            h, lp["w"], window_strides=(lp["stride"],),
            padding=[(lp["padding"], lp["padding"])],
            dimension_numbers=("NCH", "OIH", "NCH"))
        y = y + lp["b"][None, :, None]
        if i < n - 1:
            y = jnp.where(y >= 0, y, slope * y)
        features.append(y)
        h = y
    return features


# ---------------- CombineDiscriminators (exact forward semantics) ------------

class CombineDiscriminators:
    """Port of rave.discriminator.CombineDiscriminators.forward: runs every
    sub-discriminator on the same input and extends a single feature list."""

    def __init__(self, discriminators):
        self.discriminators = list(discriminators)

    def __call__(self, x):
        features = []
        for disc in self.discriminators:
            features.extend(disc(x))
        return features


if __name__ == "__main__":
    key = jax.random.PRNGKey(0)
    kx, k1, k2 = jax.random.split(key, 3)

    B, n_channels, T = 2, 1, 64
    x = jax.random.normal(kx, (B, n_channels, T), jnp.float32)

    # Two small discriminators with different receptive fields / strides.
    disc1_params = make_conv_stack_discriminator(
        k1, n_channels, [(8, 5, 2, 2), (16, 5, 2, 2), (1, 3, 1, 1)])
    disc2_params = make_conv_stack_discriminator(
        k2, n_channels, [(8, 3, 1, 1), (16, 3, 2, 1), (1, 1, 1, 0)])

    combined = CombineDiscriminators([
        functools.partial(conv_stack_forward, disc1_params),
        functools.partial(conv_stack_forward, disc2_params),
    ])

    features = combined(x)
    features = [jax.block_until_ready(f) for f in features]

    expected_shapes = [
        (B, 8, 32), (B, 16, 16), (B, 1, 16),   # disc 1
        (B, 8, 64), (B, 16, 32), (B, 1, 32),   # disc 2
    ]
    assert len(features) == len(expected_shapes)
    for f, s in zip(features, expected_shapes):
        assert f.shape == s, (f.shape, s)
        assert f.dtype == jnp.float32

    # Validate against the pure-JAX reference convolutions.
    ref_features = []
    for params in (disc1_params, disc2_params):
        ref_features.extend(conv_stack_reference(params, x))
    for got, ref in zip(features, ref_features):
        err = float(jnp.max(jnp.abs(got - ref)))
        assert err < 1e-4, f"max abs error {err}"

    print("KERNEL_OK")
</pallas_src>

<mosaic_0001>
module attributes {stable_mosaic.version = 11 : i64} {
  func.func @_disc_stack_kernel(%arg0: i32, %arg1: memref<1x1x64xf32, #tpu.memory_space<vmem>>, %arg2: memref<8x5xf32, #tpu.memory_space<vmem>>, %arg3: memref<16x40xf32, #tpu.memory_space<vmem>>, %arg4: memref<1x48xf32, #tpu.memory_space<vmem>>, %arg5: memref<8x1xf32, #tpu.memory_space<vmem>>, %arg6: memref<16x1xf32, #tpu.memory_space<vmem>>, %arg7: memref<1x1xf32, #tpu.memory_space<vmem>>, %arg8: memref<1x8x32xf32, #tpu.memory_space<vmem>>, %arg9: memref<1x16x16xf32, #tpu.memory_space<vmem>>, %arg10: memref<1x1x16xf32, #tpu.memory_space<vmem>>, %arg11: memref<16x68xf32, #tpu.memory_space<vmem>>, %arg12: memref<16x68xf32, #tpu.memory_space<vmem>>, %arg13: memref<48x128xf32, #tpu.memory_space<vmem>>) attributes {dimension_semantics = [#tpu.dimension_semantics<parallel>], iteration_bounds = array<i64: 2>, scalar_prefetch = 0 : i64, scratch_operands = 3 : i64, tpu.core_type = #tpu.core_type<tc>, window_params = [{transform_indices = @transform_0, window_bounds = array<i64: 1, 1, 64>}, {pipeline_mode = #tpu.pipeline_mode<synchronous>, transform_indices = @transform_1, window_bounds = array<i64: 8, 5>}, {pipeline_mode = #tpu.pipeline_mode<synchronous>, transform_indices = @transform_2, window_bounds = array<i64: 16, 40>}, {pipeline_mode = #tpu.pipeline_mode<synchronous>, transform_indices = @transform_3, window_bounds = array<i64: 1, 48>}, {pipeline_mode = #tpu.pipeline_mode<synchronous>, transform_indices = @transform_4, window_bounds = array<i64: 8, 1>}, {pipeline_mode = #tpu.pipeline_mode<synchronous>, transform_indices = @transform_5, window_bounds = array<i64: 16, 1>}, {pipeline_mode = #tpu.pipeline_mode<synchronous>, transform_indices = @transform_6, window_bounds = array<i64: 1, 1>}, {transform_indices = @transform_7, window_bounds = array<i64: 1, 8, 32>}, {transform_indices = @transform_8, window_bounds = array<i64: 1, 16, 16>}, {transform_indices = @transform_9, window_bounds = array<i64: 1, 1, 16>}]} {
    %cst = arith.constant 0.000000e+00 : f32
    %0 = vector.broadcast %cst : f32 to vector<16x68xf32>
    %c0 = arith.constant 0 : index
    %c0_0 = arith.constant 0 : index
    %1 = vector.load %arg11[%c0, %c0_0] : memref<16x68xf32, #tpu.memory_space<vmem>>, vector<16x68xf32>
    tpu.vector_store %arg11[%c0, %c0_0], %0 {strides = array<i32>} : memref<16x68xf32, #tpu.memory_space<vmem>>, vector<16x68xf32>,
    %c0_1 = arith.constant 0 : index
    %c0_2 = arith.constant 0 : index
    %c0_3 = arith.constant 0 : index
    %2 = vector.load %arg1[%c0_1, %c0_2, %c0_3] : memref<1x1x64xf32, #tpu.memory_space<vmem>>, vector<1x1x64xf32>
    %3 = vector.shape_cast %2 : vector<1x1x64xf32> to vector<1x64xf32>
    %c0_4 = arith.constant 0 : index
    %c2 = arith.constant 2 : index
    %4 = vector.load %arg11[%c0_4, %c2] : memref<16x68xf32, #tpu.memory_space<vmem>>, vector<1x64xf32>
    tpu.vector_store %arg11[%c0_4, %c2], %3 {strides = array<i32>} : memref<16x68xf32, #tpu.memory_space<vmem>>, vector<1x64xf32>,
    %c0_5 = arith.constant 0 : index
    %c0_6 = arith.constant 0 : index
    %5 = vector.load %arg2[%c0_5, %c0_6] : memref<8x5xf32, #tpu.memory_space<vmem>>, vector<8x5xf32>
    %c0_7 = arith.constant 0 : index
    %c0_8 = arith.constant 0 : index
    %6 = vector.load %arg5[%c0_7, %c0_8] : memref<8x1xf32, #tpu.memory_space<vmem>>, vector<8x1xf32>
    %cst_9 = arith.constant 0.000000e+00 : f32
    %7 = vector.broadcast %cst_9 : f32 to vector<8x64xf32>
    %8 = vector.extract_strided_slice %5 {offsets = [0, 0], sizes = [8, 1], strides = [1, 1]} : vector<8x5xf32> to vector<8x1xf32>
    %c0_10 = arith.constant 0 : index
    %c0_11 = arith.constant 0 : index
    %9 = vector.load %arg11[%c0_10, %c0_11] : memref<16x68xf32, #tpu.memory_space<vmem>>, vector<1x64xf32>
    %10 = vector.broadcast %8 : vector<8x1xf32> to vector<8x64xf32>
    %11 = vector.broadcast %9 : vector<1x64xf32> to vector<8x64xf32>
    %12 = arith.mulf %10, %11 : vector<8x64xf32>
    %13 = arith.addf %7, %12 : vector<8x64xf32>
    %14 = vector.extract_strided_slice %5 {offsets = [0, 1], sizes = [8, 1], strides = [1, 1]} : vector<8x5xf32> to vector<8x1xf32>
    %c0_12 = arith.constant 0 : index
    %c1 = arith.constant 1 : index
    %15 = vector.load %arg11[%c0_12, %c1] : memref<16x68xf32, #tpu.memory_space<vmem>>, vector<1x64xf32>
    %16 = vector.broadcast %14 : vector<8x1xf32> to vector<8x64xf32>
    %17 = vector.broadcast %15 : vector<1x64xf32> to vector<8x64xf32>
    %18 = arith.mulf %16, %17 : vector<8x64xf32>
    %19 = arith.addf %13, %18 : vector<8x64xf32>
    %20 = vector.extract_strided_slice %5 {offsets = [0, 2], sizes = [8, 1], strides = [1, 1]} : vector<8x5xf32> to vector<8x1xf32>
    %c0_13 = arith.constant 0 : index
    %c2_14 = arith.constant 2 : index
    %21 = vector.load %arg11[%c0_13, %c2_14] : memref<16x68xf32, #tpu.memory_space<vmem>>, vector<1x64xf32>
    %22 = vector.broadcast %20 : vector<8x1xf32> to vector<8x64xf32>
    %23 = vector.broadcast %21 : vector<1x64xf32> to vector<8x64xf32>
    %24 = arith.mulf %22, %23 : vector<8x64xf32>
    %25 = arith.addf %19, %24 : vector<8x64xf32>
    %26 = vector.extract_strided_slice %5 {offsets = [0, 3], sizes = [8, 1], strides = [1, 1]} : vector<8x5xf32> to vector<8x1xf32>
    %c0_15 = arith.constant 0 : index
    %c3 = arith.constant 3 : index
    %27 = vector.load %arg11[%c0_15, %c3] : memref<16x68xf32, #tpu.memory_space<vmem>>, vector<1x64xf32>
    %28 = vector.broadcast %26 : vector<8x1xf32> to vector<8x64xf32>
    %29 = vector.broadcast %27 : vector<1x64xf32> to vector<8x64xf32>
    %30 = arith.mulf %28, %29 : vector<8x64xf32>
    %31 = arith.addf %25, %30 : vector<8x64xf32>
    %32 = vector.extract_strided_slice %5 {offsets = [0, 4], sizes = [8, 1], strides = [1, 1]} : vector<8x5xf32> to vector<8x1xf32>
    %c0_16 = arith.constant 0 : index
    %c4 = arith.constant 4 : index
    %33 = vector.load %arg11[%c0_16, %c4] : memref<16x68xf32, #tpu.memory_space<vmem>>, vector<1x64xf32>
    %34 = vector.broadcast %32 : vector<8x1xf32> to vector<8x64xf32>
    %35 = vector.broadcast %33 : vector<1x64xf32> to vector<8x64xf32>
    %36 = arith.mulf %34, %35 : vector<8x64xf32>
    %37 = arith.addf %31, %36 : vector<8x64xf32>
    %38 = tpu.iota {dimensions = array<i32: 0>} : vector<64x32xi32>
    %39 = tpu.iota {dimensions = array<i32: 1>} : vector<64x32xi32>
    %c2_i32 = arith.constant 2 : i32
    %40 = vector.broadcast %c2_i32 : i32 to vector<64x32xi32>
    %41 = arith.muli %40, %39 : vector<64x32xi32>
    %42 = arith.cmpi eq, %38, %41 : vector<64x32xi32>
    %43 = arith.extui %42 : vector<64x32xi1> to vector<64x32xi32>
    %44 = arith.sitofp %43 : vector<64x32xi32> to vector<64x32xf32>
    %cst_17 = arith.constant dense<0.000000e+00> : vector<8x32xf32>
    %45 = tpu.matmul %37, %44, %cst_17 {dimension_numbers = #tpu.dot_dimension_numbers<[1], [0], [0], [1], [0, 0, 1, 1], [], []>} : vector<8x64xf32>, vector<64x32xf32>, vector<8x32xf32> -> vector<8x32xf32>
    %46 = vector.broadcast %6 : vector<8x1xf32> to vector<8x32xf32>
    %47 = arith.addf %45, %46 : vector<8x32xf32>
    %cst_18 = arith.constant 0.000000e+00 : f32
    %48 = vector.broadcast %cst_18 : f32 to vector<8x32xf32>
    %49 = arith.cmpf oge, %47, %48 : vector<8x32xf32>
    %cst_19 = arith.constant 2.000000e-01 : f32
    %50 = vector.broadcast %cst_19 : f32 to vector<8x32xf32>
    %51 = arith.mulf %50, %47 : vector<8x32xf32>
    %52 = arith.select %49, %47, %51 : vector<8x32xi1>, vector<8x32xf32>
    %c0_20 = arith.constant 0 : index
    %c0_21 = arith.constant 0 : index
    %c0_22 = arith.constant 0 : index
    %53 = vector.load %arg8[%c0_20, %c0_21, %c0_22] : memref<1x8x32xf32, #tpu.memory_space<vmem>>, vector<1x8x32xf32>
    %54 = vector.shape_cast %53 : vector<1x8x32xf32> to vector<8x32xf32>
    %55 = vector.shape_cast %52 : vector<8x32xf32> to vector<1x8x32xf32>
    tpu.vector_store %arg8[%c0_20, %c0_21, %c0_22], %55 {strides = array<i32>} : memref<1x8x32xf32, #tpu.memory_space<vmem>>, vector<1x8x32xf32>,
    %cst_23 = arith.constant 0.000000e+00 : f32
    %56 = vector.broadcast %cst_23 : f32 to vector<16x68xf32>
    %c0_24 = arith.constant 0 : index
    %c0_25 = arith.constant 0 : index
    %57 = vector.load %arg12[%c0_24, %c0_25] : memref<16x68xf32, #tpu.memory_space<vmem>>, vector<16x68xf32>
    tpu.vector_store %arg12[%c0_24, %c0_25], %56 {strides = array<i32>} : memref<16x68xf32, #tpu.memory_space<vmem>>, vector<16x68xf32>,
    %c0_26 = arith.constant 0 : index
    %c2_27 = arith.constant 2 : index
    %58 = vector.load %arg12[%c0_26, %c2_27] : memref<16x68xf32, #tpu.memory_space<vmem>>, vector<8x32xf32>
    tpu.vector_store %arg12[%c0_26, %c2_27], %52 {strides = array<i32>} : memref<16x68xf32, #tpu.memory_space<vmem>>, vector<8x32xf32>,
    %c0_28 = arith.constant 0 : index
    %c0_29 = arith.constant 0 : index
    %59 = vector.load %arg3[%c0_28, %c0_29] : memref<16x40xf32, #tpu.memory_space<vmem>>, vector<16x40xf32>
    %c0_30 = arith.constant 0 : index
    %c0_31 = arith.constant 0 : index
    %60 = vector.load %arg6[%c0_30, %c0_31] : memref<16x1xf32, #tpu.memory_space<vmem>>, vector<16x1xf32>
    %c0_32 = arith.constant 0 : index
    %c0_33 = arith.constant 0 : index
    %61 = vector.load %arg12[%c0_32, %c0_33] : memref<16x68xf32, #tpu.memory_space<vmem>>, vector<8x32xf32>
    %c0_34 = arith.constant 0 : index
    %c0_35 = arith.constant 0 : index
    %62 = vector.load %arg13[%c0_34, %c0_35] : memref<48x128xf32, #tpu.memory_space<vmem>>, vector<8x32xf32>
    tpu.vector_store %arg13[%c0_34, %c0_35], %61 {strides = array<i32>} : memref<48x128xf32, #tpu.memory_space<vmem>>, vector<8x32xf32>,
    %c0_36 = arith.constant 0 : index
    %c1_37 = arith.constant 1 : index
    %63 = vector.load %arg12[%c0_36, %c1_37] : memref<16x68xf32, #tpu.memory_space<vmem>>, vector<8x32xf32>
    %c8 = arith.constant 8 : index
    %c0_38 = arith.constant 0 : index
    %64 = vector.load %arg13[%c8, %c0_38] : memref<48x128xf32, #tpu.memory_space<vmem>>, vector<8x32xf32>
    tpu.vector_store %arg13[%c8, %c0_38], %63 {strides = array<i32>} : memref<48x128xf32, #tpu.memory_space<vmem>>, vector<8x32xf32>,
    %c0_39 = arith.constant 0 : index
    %c2_40 = arith.constant 2 : index
    %65 = vector.load %arg12[%c0_39, %c2_40] : memref<16x68xf32, #tpu.memory_space<vmem>>, vector<8x32xf32>
    %c16 = arith.constant 16 : index
    %c0_41 = arith.constant 0 : index
    %66 = vector.load %arg13[%c16, %c0_41] : memref<48x128xf32, #tpu.memory_space<vmem>>, vector<8x32xf32>
    tpu.vector_store %arg13[%c16, %c0_41], %65 {strides = array<i32>} : memref<48x128xf32, #tpu.memory_space<vmem>>, vector<8x32xf32>,
    %c0_42 = arith.constant 0 : index
    %c3_43 = arith.constant 3 : index
    %67 = vector.load %arg12[%c0_42, %c3_43] : memref<16x68xf32, #tpu.memory_space<vmem>>, vector<8x32xf32>
    %c24 = arith.constant 24 : index
    %c0_44 = arith.constant 0 : index
    %68 = vector.load %arg13[%c24, %c0_44] : memref<48x128xf32, #tpu.memory_space<vmem>>, vector<8x32xf32>
    tpu.vector_store %arg13[%c24, %c0_44], %67 {strides = array<i32>} : memref<48x128xf32, #tpu.memory_space<vmem>>, vector<8x32xf32>,
    %c0_45 = arith.constant 0 : index
    %c4_46 = arith.constant 4 : index
    %69 = vector.load %arg12[%c0_45, %c4_46] : memref<16x68xf32, #tpu.memory_space<vmem>>, vector<8x32xf32>
    %c32 = arith.constant 32 : index
    %c0_47 = arith.constant 0 : index
    %70 = vector.load %arg13[%c32, %c0_47] : memref<48x128xf32, #tpu.memory_space<vmem>>, vector<8x32xf32>
    tpu.vector_store %arg13[%c32, %c0_47], %69 {strides = array<i32>} : memref<48x128xf32, #tpu.memory_space<vmem>>, vector<8x32xf32>,
    %c0_48 = arith.constant 0 : index
    %c0_49 = arith.constant 0 : index
    %71 = vector.load %arg13[%c0_48, %c0_49] : memref<48x128xf32, #tpu.memory_space<vmem>>, vector<40x32xf32>
    %cst_50 = arith.constant dense<0.000000e+00> : vector<16x32xf32>
    %72 = tpu.matmul %59, %71, %cst_50 {dimension_numbers = #tpu.dot_dimension_numbers<[1], [0], [0], [1], [0, 0, 1, 1], [], []>} : vector<16x40xf32>, vector<40x32xf32>, vector<16x32xf32> -> vector<16x32xf32>
    %73 = tpu.iota {dimensions = array<i32: 0>} : vector<32x16xi32>
    %74 = tpu.iota {dimensions = array<i32: 1>} : vector<32x16xi32>
    %c2_i32_51 = arith.constant 2 : i32
    %75 = vector.broadcast %c2_i32_51 : i32 to vector<32x16xi32>
    %76 = arith.muli %75, %74 : vector<32x16xi32>
    %77 = arith.cmpi eq, %73, %76 : vector<32x16xi32>
    %78 = arith.extui %77 : vector<32x16xi1> to vector<32x16xi32>
    %79 = arith.sitofp %78 : vector<32x16xi32> to vector<32x16xf32>
    %cst_52 = arith.constant dense<0.000000e+00> : vector<16x16xf32>
    %80 = tpu.matmul %72, %79, %cst_52 {dimension_numbers = #tpu.dot_dimension_numbers<[1], [0], [0], [1], [0, 0, 1, 1], [], []>} : vector<16x32xf32>, vector<32x16xf32>, vector<16x16xf32> -> vector<16x16xf32>
    %81 = vector.broadcast %60 : vector<16x1xf32> to vector<16x16xf32>
    %82 = arith.addf %80, %81 : vector<16x16xf32>
    %cst_53 = arith.constant 0.000000e+00 : f32
    %83 = vector.broadcast %cst_53 : f32 to vector<16x16xf32>
    %84 = arith.cmpf oge, %82, %83 : vector<16x16xf32>
    %cst_54 = arith.constant 2.000000e-01 : f32
    %85 = vector.broadcast %cst_54 : f32 to vector<16x16xf32>
    %86 = arith.mulf %85, %82 : vector<16x16xf32>
    %87 = arith.select %84, %82, %86 : vector<16x16xi1>, vector<16x16xf32>
    %c0_55 = arith.constant 0 : index
    %c0_56 = arith.constant 0 : index
    %c0_57 = arith.constant 0 : index
    %88 = vector.load %arg9[%c0_55, %c0_56, %c0_57] : memref<1x16x16xf32, #tpu.memory_space<vmem>>, vector<1x16x16xf32>
    %89 = vector.shape_cast %88 : vector<1x16x16xf32> to vector<16x16xf32>
    %90 = vector.shape_cast %87 : vector<16x16xf32> to vector<1x16x16xf32>
    tpu.vector_store %arg9[%c0_55, %c0_56, %c0_57], %90 {strides = array<i32>} : memref<1x16x16xf32, #tpu.memory_space<vmem>>, vector<1x16x16xf32>,
    %cst_58 = arith.constant 0.000000e+00 : f32
    %91 = vector.broadcast %cst_58 : f32 to vector<16x68xf32>
    %c0_59 = arith.constant 0 : index
    %c0_60 = arith.constant 0 : index
    %92 = vector.load %arg11[%c0_59, %c0_60] : memref<16x68xf32, #tpu.memory_space<vmem>>, vector<16x68xf32>
    tpu.vector_store %arg11[%c0_59, %c0_60], %91 {strides = array<i32>} : memref<16x68xf32, #tpu.memory_space<vmem>>, vector<16x68xf32>,
    %c0_61 = arith.constant 0 : index
    %c1_62 = arith.constant 1 : index
    %93 = vector.load %arg11[%c0_61, %c1_62] : memref<16x68xf32, #tpu.memory_space<vmem>>, vector<16x16xf32>
    tpu.vector_store %arg11[%c0_61, %c1_62], %87 {strides = array<i32>} : memref<16x68xf32, #tpu.memory_space<vmem>>, vector<16x16xf32>,
    %c0_63 = arith.constant 0 : index
    %c0_64 = arith.constant 0 : index
    %94 = vector.load %arg4[%c0_63, %c0_64] : memref<1x48xf32, #tpu.memory_space<vmem>>, vector<1x48xf32>
    %c0_65 = arith.constant 0 : index
    %c0_66 = arith.constant 0 : index
    %95 = vector.load %arg7[%c0_65, %c0_66] : memref<1x1xf32, #tpu.memory_space<vmem>>, vector<1x1xf32>
    %c0_67 = arith.constant 0 : index
    %c0_68 = arith.constant 0 : index
    %96 = vector.load %arg11[%c0_67, %c0_68] : memref<16x68xf32, #tpu.memory_space<vmem>>, vector<16x16xf32>
    %c0_69 = arith.constant 0 : index
    %c0_70 = arith.constant 0 : index
    %97 = vector.load %arg13[%c0_69, %c0_70] : memref<48x128xf32, #tpu.memory_space<vmem>>, vector<16x16xf32>
    tpu.vector_store %arg13[%c0_69, %c0_70], %96 {strides = array<i32>} : memref<48x128xf32, #tpu.memory_space<vmem>>, vector<16x16xf32>,
    %c0_71 = arith.constant 0 : index
    %c1_72 = arith.constant 1 : index
    %98 = vector.load %arg11[%c0_71, %c1_72] : memref<16x68xf32, #tpu.memory_space<vmem>>, vector<16x16xf32>
    %c16_73 = arith.constant 16 : index
    %c0_74 = arith.constant 0 : index
    %99 = vector.load %arg13[%c16_73, %c0_74] : memref<48x128xf32, #tpu.memory_space<vmem>>, vector<16x16xf32>
    tpu.vector_store %arg13[%c16_73, %c0_74], %98 {strides = array<i32>} : memref<48x128xf32, #tpu.memory_space<vmem>>, vector<16x16xf32>,
    %c0_75 = arith.constant 0 : index
    %c2_76 = arith.constant 2 : index
    %100 = vector.load %arg11[%c0_75, %c2_76] : memref<16x68xf32, #tpu.memory_space<vmem>>, vector<16x16xf32>
    %c32_77 = arith.constant 32 : index
    %c0_78 = arith.constant 0 : index
    %101 = vector.load %arg13[%c32_77, %c0_78] : memref<48x128xf32, #tpu.memory_space<vmem>>, vector<16x16xf32>
    tpu.vector_store %arg13[%c32_77, %c0_78], %100 {strides = array<i32>} : memref<48x128xf32, #tpu.memory_space<vmem>>, vector<16x16xf32>,
    %c0_79 = arith.constant 0 : index
    %c0_80 = arith.constant 0 : index
    %102 = vector.load %arg13[%c0_79, %c0_80] : memref<48x128xf32, #tpu.memory_space<vmem>>, vector<48x16xf32>
    %cst_81 = arith.constant dense<0.000000e+00> : vector<1x16xf32>
    %103 = tpu.matmul %94, %102, %cst_81 {dimension_numbers = #tpu.dot_dimension_numbers<[1], [0], [0], [1], [0, 0, 1, 1], [], []>} : vector<1x48xf32>, vector<48x16xf32>, vector<1x16xf32> -> vector<1x16xf32>
    %104 = vector.broadcast %95 : vector<1x1xf32> to vector<1x16xf32>
    %105 = arith.addf %103, %104 : vector<1x16xf32>
    %c0_82 = arith.constant 0 : index
    %c0_83 = arith.constant 0 : index
    %c0_84 = arith.constant 0 : index
    %106 = vector.load %arg10[%c0_82, %c0_83, %c0_84] : memref<1x1x16xf32, #tpu.memory_space<vmem>>, vector<1x1x16xf32>
    %107 = vector.shape_cast %106 : vector<1x1x16xf32> to vector<1x16xf32>
    %108 = vector.shape_cast %105 : vector<1x16xf32> to vector<1x1x16xf32>
    tpu.vector_store %arg10[%c0_82, %c0_83, %c0_84], %108 {strides = array<i32>} : memref<1x1x16xf32, #tpu.memory_space<vmem>>, vector<1x1x16xf32>,
    return
  }
  func.func @transform_0(%arg0: i32) -> (i32, i32, i32) {
    %c0_i32 = arith.constant 0 : i32
    %c0_i32_0 = arith.constant 0 : i32
    %c0_i32_1 = arith.constant 0 : i32
    return %arg0, %c0_i32, %c0_i32_0 : i32, i32, i32
  }
  func.func @transform_1(%arg0: i32) -> (i32, i32) {
    %c0_i32 = arith.constant 0 : i32
    %c0_i32_0 = arith.constant 0 : i32
    %c0_i32_1 = arith.constant 0 : i32
    return %c0_i32, %c0_i32_0 : i32, i32
  }
  func.func @transform_2(%arg0: i32) -> (i32, i32) {
    %c0_i32 = arith.constant 0 : i32
    %c0_i32_0 = arith.constant 0 : i32
    %c0_i32_1 = arith.constant 0 : i32
    return %c0_i32, %c0_i32_0 : i32, i32
  }
  func.func @transform_3(%arg0: i32) -> (i32, i32) {
    %c0_i32 = arith.constant 0 : i32
    %c0_i32_0 = arith.constant 0 : i32
    %c0_i32_1 = arith.constant 0 : i32
    return %c0_i32, %c0_i32_0 : i32, i32
  }
  func.func @transform_4(%arg0: i32) -> (i32, i32) {
    %c0_i32 = arith.constant 0 : i32
    %c0_i32_0 = arith.constant 0 : i32
    %c0_i32_1 = arith.constant 0 : i32
    return %c0_i32, %c0_i32_0 : i32, i32
  }
  func.func @transform_5(%arg0: i32) -> (i32, i32) {
    %c0_i32 = arith.constant 0 : i32
    %c0_i32_0 = arith.constant 0 : i32
    %c0_i32_1 = arith.constant 0 : i32
    return %c0_i32, %c0_i32_0 : i32, i32
  }
  func.func @transform_6(%arg0: i32) -> (i32, i32) {
    %c0_i32 = arith.constant 0 : i32
    %c0_i32_0 = arith.constant 0 : i32
    %c0_i32_1 = arith.constant 0 : i32
    return %c0_i32, %c0_i32_0 : i32, i32
  }
  func.func @transform_7(%arg0: i32) -> (i32, i32, i32) {
    %c0_i32 = arith.constant 0 : i32
    %c0_i32_0 = arith.constant 0 : i32
    %c0_i32_1 = arith.constant 0 : i32
    return %arg0, %c0_i32, %c0_i32_0 : i32, i32, i32
  }
  func.func @transform_8(%arg0: i32) -> (i32, i32, i32) {
    %c0_i32 = arith.constant 0 : i32
    %c0_i32_0 = arith.constant 0 : i32
    %c0_i32_1 = arith.constant 0 : i32
    return %arg0, %c0_i32, %c0_i32_0 : i32, i32, i32
  }
  func.func @transform_9(%arg0: i32) -> (i32, i32, i32) {
    %c0_i32 = arith.constant 0 : i32
    %c0_i32_0 = arith.constant 0 : i32
    %c0_i32_1 = arith.constant 0 : i32
    return %arg0, %c0_i32, %c0_i32_0 : i32, i32, i32
  }
}

</mosaic_0001>

<bundles_post_ra>
// kernel: tpu_custom_call.1
= control target key start
LH: loop header
LB: loop body
LE: loop exit
PB: predicated region body
PF: predicated region fallthrough
CT: control target
= control target key end

     0   :  { %s1775_s0 = inlined_call_operand.vmem [shape: f32[2,1,64], index: 0, kind: input, shape index: {}]   ;;  %s1776_s1 = inlined_call_operand.vmem [shape: f32[8,5], index: 1, kind: input, shape index: {}]   ;;  %s1777_s2 = inlined_call_operand.vmem [shape: f32[16,40], index: 2, kind: input, shape index: {}]   ;;  %s1778_s3 = inlined_call_operand.vmem [shape: f32[1,48], index: 3, kind: input, shape index: {}]   ;;  %s1779_s4 = inlined_call_operand.vmem [shape: f32[8,1], index: 4, kind: input, shape index: {}]   ;;  %s1780_s5 = inlined_call_operand.vmem [shape: f32[16,1], index: 5, kind: input, shape index: {}]   ;;  %s1781_s6 = inlined_call_operand.<no memory space> [shape: f32[1,1], index: 6, kind: input, shape index: {}]   ;;  %s1782_s7 = inlined_call_operand.hbm [shape: f32[2,8,32], index: 7, kind: output, shape index: {0}]   ;;  %s1783_s8 = inlined_call_operand.hbm [shape: f32[2,16,16], index: 8, kind: output, shape index: {1}]   ;;  %s1784_s9 = inlined_call_operand.hbm [shape: f32[2,1,16], index: 9, kind: output, shape index: {2}]  }
   0x1   :  { %1786 = sst [smem:[#allocation13_spill]] %s1775_s0  ;;  %v15_v0 = vstv %s1781_s6 }
   0x2   :  { %1787 = sst [smem:[#allocation14_spill]] %s1776_s1  ;;  %16 = vst [vmem:[#allocation5] sm:$0x1] %v15_v0 }
   0x3   :  { %1788 = sst [smem:[#allocation15_spill]] %s1777_s2 }
   0x4   :  { %1789 = sst [smem:[#allocation16_spill]] %s1778_s3 }
   0x5   :  { %17 = vsyncpa [#allocation7], 0 }
   0x6   :  { %19 = vsyncpa [#allocation7 + $0x1], 0 }
   0x7   :  { %20 = vsyncpa [#allocation9], 0 }
   0x8   :  { %22 = vsyncpa [#allocation9 + $0x1], 0  ;;  %s1492_s11 = smov 0   ;;  %s1494_s12 = smov 0  }
   0x9   :  { %s1496_s13 = smov 0   ;;  %s1498_s14 = smov 0  }
   0xa LB: > { %s1513_s6 = sadd.s32 4294967295, %s1417_s14   ;;  %s1785_s15 = sadd.s32 4294967294, %s1417_s14   ;;  %s1417_s14 = sphi %s1498_s14, %s1804_s14   ;;  %s1413_s13 = sphi %s1496_s13, %s1803_s13   ;;  %s1409_s12 = sphi %s1494_s12, %s1802_s12   ;;  %s1405_s11 = sphi %s1492_s11, %s1801_s11  }
   0xb   : > { %s1517_s16 = sadd.s32 1, %s1417_s14   ;;  %s187_s17 = sadd.s32 1, %s1413_s13 }
   0xc   : > { %s184_s18 = ssub.s32 %s1417_s14, %s1517_s16  ;;  %p197_p0 = scmp.ne.s32.totalorder %s1413_s13, %s1409_s12 }
   0xd   : > { %p185_p1 = scmp.eq.s32.totalorder %s184_s18, 0  ;;  %p198_p2 = scmp.eq.s32.totalorder %s1513_s6, 1 }
   0xe   : > { %p203_p3 = scmp.ne.s32.totalorder %s1409_s12, %s1405_s11  ;;  %p204_p4 = scmp.eq.s32.totalorder %s1785_s15, 1 }
   0xf   : > { %s1530_s19 = scalar_select %p185_p1, %s1413_s13, %s187_s17  }
  0x10   : > { %p1532_p5 = por %p198_p2, %p197_p0  ;;  %p1536_p6 = por %p204_p4, %p203_p3 }
  0x11   : > { %p1059_p7 = scmp.ge.s32.totalorder %s1417_s14, 1  ;;  %p298_p8 = scmp.lt.s32.totalorder %s1417_s14, 3 }
  0x13   : > { %p299_p9 = pnand %p1059_p7, %p298_p8 }
  0x14   : > { %s1792_s1 = sld [smem:[#allocation14_spill]] (!%p299_p9)  ;;  %p341_p10 = scmp.lt.s32.totalorder (!%p299_p9), %s1513_s6, 1  ;;  %v1419_v2 = vmov (!%p299_p9), 2   ;;  %v1420_v3 = vmov (!%p299_p9), 1   ;;  %vm344_vm0 = vcmask (!%p299_p9), 556032   ;;  %v1421_v4 = vmov (!%p299_p9), 0.0  }
  0x15   : > { %302 = sbr.rel (%p299_p9) target bundleno = 1681 (0x691), region = 48  ;;  %1290 = vset.pattern.permute.xlu1 (!%p299_p9), %v1419_v2  ;;  %1289 = vset.pattern.permute.xlu0 (!%p299_p9), %v1420_v3  ;;  %345 = vst.msk [vmem:[#allocation2] sm:$0xff] (!%p299_p9), %vm344_vm0, %v1421_v4  ;;  %346 = vst.msk [vmem:[#allocation2 + $0x8] sm:$0xff] (!%p299_p9), %vm344_vm0, %v1421_v4  ;;  %s1793_s0 = sld [smem:[#allocation13_spill]] (!%p299_p9)  ;;  %v1422_v6 = vmov (!%p299_p9), 3   ;;  %v1424_v7 = vmov (!%p299_p9), 4   ;;  %v412_v9 = vlaneseq (!%p299_p9) }
  0x16   : > { %532 = vst.msk [vmem:[#allocation3] sm:$0xff] (!%p299_p9), %vm344_vm0, %v1421_v4  ;;  %758 = vst.msk [vmem:[#allocation2 + $0x8] sm:$0xff] (!%p299_p9), %vm344_vm0, %v1421_v4  ;;  %s1423_s28 = smov (!%p299_p9), 2   ;;  %v1425_v8 = vmov (!%p299_p9), 0   ;;  %v1426_v10 = vmov (!%p299_p9), 0.0|0.0   ;;  %vm356_vm4 = vcmask (!%p299_p9), 532496  }
  0x17   : > { %1186 = vmatprep.subr.bf16.mxu0 (!%p299_p9), %v1426_v10  ;;  %v1560_v11 = vshrl.u32 (!%p299_p9), %v412_v9, 7  ;;  %v422_v12 = vand.u32 (!%p299_p9), 127, %v412_v9  ;;  %v1427_v16 = vmov (!%p299_p9), 1.0|1.0   ;;  %vm1428_vm14 = vmmov (!%p299_p9), 0   ;;  %s1429_s29 = smov (!%p299_p9), 125  }
  0x18   : > { %1144 = vmatprep.mubr.msk.f32.mxu0 (!%p299_p9), %vm1428_vm14, %v1421_v4  ;;  %v359_v31 = vld [vmem:[%s1779_s4] sm:$0xff] (!%p299_p9)  ;;  %s1430_s17 = smov (!%p299_p9), 127   ;;  %s1431_s18 = smov (!%p299_p9), 126   ;;  %vm453_vm15 = vcmask (!%p299_p9), 523264   ;;  %v543_v3 = vld [vmem:[%s1780_s5 + $0x8] sm:$0xff] (!%p299_p9) }
  0x19   : > { %v414_v13 = vadd.s32 (!%p299_p9), 8, %v1560_v11  ;;  %v423_v14 = vmul.u32 (!%p299_p9), 2, %v422_v12  ;;  %v415_v18 = vadd.s32 (!%p299_p9), 16, %v1560_v11  ;;  %v416_v19 = vadd.s32 (!%p299_p9), 24, %v1560_v11  ;;  %s1432_s22 = smov (!%p299_p9), 124   ;;  %s1604_s23 = sand.u32 (!%p299_p9), 1, %s1409_s12  }
  0x1a   : > { %v358_v1 = vld [vmem:[%s1792_s1] sm:$0xff] (!%p299_p9)  ;;  %v417_v21 = vadd.s32 (!%p299_p9), 32, %v1560_v11  ;;  %v418_v22 = vadd.s32 (!%p299_p9), 40, %v1560_v11  ;;  %v419_v25 = vadd.s32 (!%p299_p9), 48, %v1560_v11  ;;  %v420_v26 = vadd.s32 (!%p299_p9), 56, %v1560_v11  ;;  %s1798_s2 = sld [smem:[#allocation15_spill]] (!%p299_p9) }
  0x1b   : > { %383 = vperm.xlu1 (!%p299_p9), %1290, %v358_v1   ;;  %vm424_vm1 = vcmp.eq.s32.totalorder (!%p299_p9), %v1560_v11, %v423_v14  ;;  %vm425_vm2 = vcmp.eq.s32.totalorder (!%p299_p9), %v414_v13, %v423_v14  ;;  %vm426_vm5 = vcmp.eq.s32.totalorder (!%p299_p9), %v415_v18, %v423_v14  ;;  %vm427_vm6 = vcmp.eq.s32.totalorder (!%p299_p9), %v416_v19, %v423_v14  ;;  %v542_v53 = vld [vmem:[%s1780_s5] sm:$0xff] (!%p299_p9)  ;;  %s1061_s26 = sshll.u32 (!%p299_p9), %s1604_s23, 4  ;;  %s1799_s3 = sld [smem:[#allocation16_spill]] (!%p299_p9) }
  0x1c   : > { %s342_s24 = scalar_select %p341_p10, %s1513_s6, 1  ;;  %vm1564_vm3 = vmpackc.low %vm425_vm2, %vm424_vm1  ;;  %vm428_vm8 = vcmp.eq.s32.totalorder %v417_v21, %v423_v14  ;;  %vm429_vm9 = vcmp.eq.s32.totalorder %v418_v22, %v423_v14  ;;  %vm430_vm11 = vcmp.eq.s32.totalorder %v419_v25, %v423_v14  ;;  %vm431_vm12 = vcmp.eq.s32.totalorder %v420_v26, %v423_v14  ;;  %v771_v22 = vld [vmem:[#allocation5] sm:$0x1] }
  0x1d   : > { %1188 = vmatpush3.bf16.msk.msra.mxu0 %vm1564_vm3, %v1427_v16  ;;  %vm1574_vm7 = vmpackc.low %vm427_vm6, %vm426_vm5  ;;  %vm530_vm1 = vcmask 261120   ;;  %vm538_vm2 = vcmask 277520   ;;  %vm754_vm5 = vcmask 130048   ;;  %s1098_s10 = sshll.u32 %s1513_s6, 8 }
  0x1e   : > { %s343_s27 = scalar_lea.vmem %s1793_s0, %s342_s24  ;;  %1189 = vmatprep.subr.bf16.mxu0 %v1426_v10  ;;  %vm1193_vm10 = vmpackc.low %vm429_vm9, %vm428_vm8  ;;  %s1060_s24 = sshll.u32 %s1604_s23, 3  ;;  %vm815_vm8 = vcmask 392192  }
  0x1f   : > { %v1062_v5 = vld [vmem:[%s343_s27] ss:$0 sm:$0xff]  ;;  %1291 = vset.pattern.permute.xlu1 %v1422_v6  ;;  %vm1196_vm13 = vmpackc.low %vm431_vm12, %vm430_vm11  ;;  %s1608_s25 = scalar_lea.vmem [#allocation6], %s1060_s24  ;;  %s1433_s27 = smov 1  }
  0x20   : > { %353 = vrot.lane.b32.xlu0 %v1062_v5, %s1423_s28  ;;  %393 = vperm.xlu1 %1291, %v358_v1   ;;  %v540_v54 = vld [vmem:[%s1798_s2] sm:$0xff]  ;;  %v541_v2 = vld [vmem:[%s1798_s2 + $0x8] sm:$0xff] }
  0x21   : > { %1191 = vmatpush3.bf16.msk.msra.mxu0 %vm1574_vm7, %v1427_v16 }
  0x22   : > { %1192 = vmatprep.subr.bf16.mxu0 %v1426_v10 }
  0x24   : > { %373 = vperm.xlu0 %1289, %v358_v1   ;;  %1292 = vset.pattern.permute.xlu1 %v1424_v7 }
  0x25   : > { %403 = vperm.xlu1 %1292, %v358_v1   ;;  %1194 = vmatpush3.bf16.msk.msra.mxu0 %vm1193_vm10, %v1427_v16 }
  0x26   : > { %1195 = vmatprep.subr.bf16.mxu0 %v1426_v10 }
  0x28   : > { %1293 = vset.pattern.permute.xlu0 %v1425_v8 }
  0x29   : > { %363 = vperm.xlu0 %1293, %v358_v1   ;;  %1294 = vset.pattern.permute.xlu1 %v1425_v8 }
  0x2a   : > { %1197 = vmatpush3.bf16.msk.msra.mxu0 %vm1196_vm13, %v1427_v16 }
  0x2b   : > { %1214 = vmatprep.subr.bf16.mxu0 %v1426_v10 }
  0x92   : > { %v354_v17 = vpop.permute.xlu0 %353 }
  0x93   : > { %357 = vst.msk [vmem:[#allocation2] sm:$0x1] %vm356_vm4, %v354_v17  ;;  %vm575_vm4 = vcmask 326656  }
  0x94   : > { %1157 = vmatprep.mubr.msk.f32.mxu1 %vm575_vm4, %v540_v54 }
  0x9a   : > { %v1063_v23 = vld [vmem:[#allocation2] ss:$0 sm:$0xff]  ;;  %v384_v24 = vpop.permute.xlu1 %383 }
  0x9b   : > { %757 = vst.msk [vmem:[#allocation2] sm:$0xff] %vm344_vm0, %v1421_v4  ;;  %v386_v32 = vmul.f32 %v1063_v23, %v384_v24 }
  0x9f   : > { %v394_v27 = vpop.permute.xlu1 %393 }
  0xa0   : > { %v396_v28 = vmul.f32 %v1063_v23, %v394_v27 }
  0xa2   : > { %398 = vrot.lane.b32.xlu0 %v396_v28, %s1429_s29 }
  0xa3   : > { %v374_v29 = vpop.permute.xlu0 %373 }
  0xa4   : > { %v376_v30 = vmul.f32 %v1063_v23, %v374_v29  ;;  %v404_v33 = vpop.permute.xlu1 %403 }
  0xa5   : > { %v406_v34 = vmul.f32 %v1063_v23, %v404_v33 }
  0xa6   : > { %378 = vrot.lane.b32.xlu1 %v376_v30, %s1430_s17  ;;  %450 = vperm.xlu0 %1293, %v359_v31  }
  0xa8   : > { %v364_v35 = vpop.permute.xlu0 %363 }
  0xa9   : > { %v370_v37 = vmul.f32 %v1063_v23, %v364_v35 }
  0xaa   : > { %388 = vrot.lane.b32.xlu1 %v386_v32, %s1431_s18 }
  0xae   : > { %408 = vrot.lane.b32.xlu1 %v406_v34, %s1432_s22 }
 0x114   : > { %v399_v41 = vpop.permute.xlu0 %398 }
 0x118   : > { %v379_v36 = vpop.permute.xlu1 %378 }
 0x119   : > { %v381_v38 = vadd.f32 %v379_v36, %v370_v37  ;;  %v770_v36 = vld [vmem:[%s1799_s3] sm:$0x1] }
 0x11c   : > { %v389_v39 = vpop.permute.xlu1 %388 }
 0x11d   : > { %v391_v40 = vadd.f32 %v389_v39, %v381_v38 }
 0x11f   : > { %v401_v42 = vadd.f32 %v399_v41, %v391_v40 }
 0x120   : > { %v409_v43 = vpop.permute.xlu1 %408 }
 0x121   : > { %v411_v44 = vadd.f32 %v409_v43, %v401_v42 }
 0x123   : > { %1145 = vmatmul.mubr.msk.f32.vlgmr.msra.gmra.mrb[0].mxu0 %vm453_vm15, %v411_v44 }
 0x124   : > { %1183 = vmatprep.mubr.msk.f32.mxu0 %vm1428_vm14, %v1421_v4 }
 0x125   : > { %v451_v45 = vpop.permute.xlu0 %450 }
 0x1f6   : > { %v523_v46 = vpop.f32.mrb[0].mxu0 }
 0x1f7   : > { %v524_v47 = vadd.f32 %v523_v46, %v451_v45  ;;  %v1146_v48 = vpop.f32.mrb[1].mxu0 }
 0x1f9   : > { %v528_v49 = vmul.f32 0.2, %v524_v47  ;;  %vm527_vm0 = vcmp.ge.f32.partialorder %v524_v47, 0.0 }
 0x1fb   : > { %v529_v50 = vsel %vm527_vm0, %v524_v47, %v528_v49 }
 0x1fc   : > { %535 = vrot.lane.b32.xlu1 %v529_v50, %s1423_s28  ;;  %531 = vst.msk [vmem:[%s1608_s25] sm:$0xff] %vm530_vm1, %v529_v50  ;;  %s1650_s28 = scalar_lea.vmem [#allocation8], %s1061_s26  ;;  %s1679_s26 = scalar_lea.hbm %s1783_s8, %s1098_s10 }
 0x1fd   : > { %s927_s30 = sshll.u32 %s1650_s28, 4  ;;  %s1672_s30 = int_to_ptr.vmem [resolvable:$true] %s927_s30 }
 0x1fe   : > { %s1295_s15 = scalar_lea.vmem %s1672_s30, 256 }
 0x1ff   : > { %p1296_p11 = scmp.ne.s32.totalorder %s1672_s30, %s1295_s15 }
 0x201   : > { %p1297_p12 = pnand %p1296_p11, %p1532_p5 }
 0x203   : > { %p1298_p13 = pneg %p1297_p12 }
 0x26e   : > { %v536_v51 = vpop.permute.xlu1 %535 }
 0x26f   : > { %539 = vst.msk [vmem:[#allocation3] sm:$0xff] %vm538_vm2, %v536_v51 }
 0x276   : > { %v552_v52 = vld [vmem:[#allocation3] sm:$0xff] }
 0x277   : > { %554 = vrot.lane.b32.xlu1 %v552_v52, %s1431_s18  ;;  %548 = vrot.lane.b32.xlu0 %v552_v52, %s1430_s17  ;;  %545 = vst.msk [vmem:[#allocation4] sm:$0xff] %vm530_vm1, %v552_v52 }
 0x27b   : > { %566 = vrot.lane.b32.xlu1 %v552_v52, %s1432_s22  ;;  %560 = vrot.lane.b32.xlu0 %v552_v52, %s1429_s29  ;;  %s896_s29 = sand.u32 1, %s1513_s6  }
 0x27e   : > { %v570_v59 = vld [vmem:[#allocation4] sm:$0xff] }
 0x27f   : > { %659 = vperm.xlu0 %1293, %v542_v53   ;;  %664 = vperm.xlu1 %1294, %v543_v3  }
 0x2e9   : > { %v555_v55 = vpop.permute.xlu1 %554  ;;  %v549_v56 = vpop.permute.xlu0 %548 }
 0x2ea   : > { %557 = vst.msk [vmem:[#allocation4 + $0x10] sm:$0xff] %vm530_vm1, %v555_v55  ;;  %551 = vst.msk [vmem:[#allocation4 + $0x8] sm:$0xff] %vm530_vm1, %v549_v56 }
 0x2ed   : > { %v567_v57 = vpop.permute.xlu1 %566  ;;  %v561_v58 = vpop.permute.xlu0 %560 }
 0x2ee   : > { %569 = vst.msk [vmem:[#allocation4 + $0x20] sm:$0xff] %vm530_vm1, %v567_v57  ;;  %563 = vst.msk [vmem:[#allocation4 + $0x18] sm:$0xff] %vm530_vm1, %v561_v58 }
 0x2f1   : > { %v571_v60 = vld [vmem:[#allocation4 + $0x8] sm:$0xff]  ;;  %v572_v62 = vld [vmem:[#allocation4 + $0x10] sm:$0xff] }
 0x2f2   : > { %v1198_v61 = vpack.c.bf16 %v571_v60, %v570_v59 }
 0x2f4   : > { %1199 = vmatprep.subr.bf16.mxu1 %v1198_v61 }
 0x2f5   : > { %1201 = vmatpush3.bf16.msra.mxu1 %v1198_v61  ;;  %v573_v63 = vld [vmem:[#allocation4 + $0x18] sm:$0xff]  ;;  %v574_v1 = vld [vmem:[#allocation4 + $0x20] sm:$0xff] }
 0x2f6   : > { %v1202_v0 = vpack.c.bf16 %v573_v63, %v572_v62 }
 0x2f8   : > { %1203 = vmatprep.subr.bf16.mxu1 %v1202_v0 }
 0x2f9   : > { %1205 = vmatpush3.bf16.msra.mxu1 %v1202_v0 }
 0x2fa   : > { %1155 = vmatprep.subr.mxu1 %v574_v1 }
 0x2fd   : > { %1156 = vmatpush3.msra.mxu1 %v574_v1 }
 0x2fe   : > { %1158 = vmatmul.mubr.msk.f32.vlgmr.msra.gmra.mrb[0].mxu1 %vm575_vm4, %v541_v2  ;;  %1207 = vmatprep.subr.msk.bf16.mxu1 %vm1564_vm3, %v1427_v16  ;;  %v665_v6 = vpop.permute.xlu1 %664  ;;  %v660_v8 = vpop.permute.xlu0 %659 }
 0x2ff   : > { %1209 = vmatpush3.bf16.msk.msra.mxu1 %vm1564_vm3, %v1427_v16 }
 0x300   : > { %1211 = vmatprep.subr.msk.bf16.mxu1 %vm1574_vm7, %v1427_v16 }
 0x303   : > { %1213 = vmatpush3.bf16.msk.msra.mxu1 %vm1574_vm7, %v1427_v16  ;;  %vm767_vm7 = vcmask 138248  }
 0x3d1   : > { %v1159_v4 = vpop.f32.mrb[0].mxu1 }
 0x3d2   : > { %v648_v5 = vpop.f32.mrb[1].mxu1 }
 0x3d3   : > { %1168 = vmatprep.mubr.msk.f32.mxu1 %vm530_vm1, %v648_v5 }
 0x3d4   : > { %1169 = vmatmul.mubr.msk.f32.vlgmr.msra.gmra.mrb[2].mxu1 %vm530_vm1, %v1159_v4 }
 0x4a7   : > { %v1170_v7 = vpop.f32.mrb[2].mxu1 }
 0x4a8   : > { %v745_v9 = vadd.f32 %v1170_v7, %v665_v6  ;;  %v739_v12 = vpop.f32.mrb[3].mxu1 }
 0x4a9   : > { %v740_v13 = vadd.f32 %v739_v12, %v660_v8 }
 0x4aa   : > { %v751_v14 = vmul.f32 0.2, %v745_v9  ;;  %vm749_vm3 = vcmp.ge.f32.partialorder %v745_v9, 0.0 }
 0x4ab   : > { %v750_v15 = vmul.f32 0.2, %v740_v13  ;;  %vm748_vm6 = vcmp.ge.f32.partialorder %v740_v13, 0.0 }
 0x4ac   : > { %v753_v16 = vsel %vm749_vm3, %v745_v9, %v751_v14 }
 0x4ad   : > { %763 = vrot.lane.b32.xlu1 %v753_v16, %s1433_s27  ;;  %756 = vst.msk [vmem:[%s1650_s28 + $0x8] sm:$0xff] %vm754_vm5, %v753_v16  ;;  %v752_v17 = vsel %vm748_vm6, %v740_v13, %v750_v15 }
 0x4ae   : > { %761 = vrot.lane.b32.xlu0 %v752_v17, %s1433_s27  ;;  %755 = vst.msk [vmem:[%s1650_s28] sm:$0xff] %vm754_vm5, %v752_v17  ;;  %s1681_s27 = scalar_lea.sflag [#allocation9], %s896_s29  ;;  %s1434_s28 = smov [#allocation8]  }
 0x51f   : > { %v764_v18 = vpop.permute.xlu1 %763 }
 0x520   : > { %769 = vst.msk [vmem:[#allocation2 + $0x8] sm:$0xff] %vm767_vm7, %v764_v18  ;;  %v762_v19 = vpop.permute.xlu0 %761 }
 0x521   : > { %768 = vst.msk [vmem:[#allocation2] sm:$0xff] %vm767_vm7, %v762_v19 }
 0x527   : > { %v773_v20 = vld [vmem:[#allocation2 + $0x8] sm:$0xff] }
 0x528   : > { %775 = vst.msk [vmem:[#allocation4 + $0x8] sm:$0xff] %vm754_vm5, %v773_v20  ;;  %v772_v21 = vld [vmem:[#allocation2] sm:$0xff]  ;;  %782 = vrot.lane.b32.xlu1 %v773_v20, %s1430_s17 }
 0x529   : > { %774 = vst.msk [vmem:[#allocation4] sm:$0xff] %vm754_vm5, %v772_v21  ;;  %780 = vrot.lane.b32.xlu0 %v772_v21, %s1430_s17  ;;  %s1299_s17 = sshll.u32 %s1434_s28, 4  ;;  %s1300_s17 = int_to_ptr.vmem [resolvable:$false] %s1299_s17 }
 0x52a   : > { %p1302_p0 = scmp.lt.s32.totalorder %s1672_s30, %s1300_s17 }
 0x52c   : > { %794 = vrot.lane.b32.xlu1 %v773_v20, %s1431_s18 }
 0x52d   : > { %792 = vrot.lane.b32.xlu0 %v772_v21, %s1431_s18  ;;  %s1301_s18 = scalar_lea.vmem %s1300_s17, 512 }
 0x52e   : > { %p1303_p1 = scmp.lt.s32.totalorder %s1301_s18, %s1295_s15 }
 0x52f   : > { %v801_v23 = vld [vmem:[#allocation4 + $0x8] sm:$0xff] }
 0x530   : > { %v800_v24 = vld [vmem:[#allocation4] sm:$0xff]  ;;  %p1304_p2 = por %p1303_p1, %p1302_p0 }
 0x531   : > { %808 = vperm.xlu0 %1293, %v771_v22   ;;  %v1215_v25 = vpack.c.bf16 %v801_v23, %v800_v24 }
 0x532   : > { %p1305_p3 = pnand %p1304_p2, %p1298_p13 }
 0x533   : > { %1216 = vmatpush3.bf16.msra.mxu0 %v1215_v25 }
 0x534   : > { %1217 = vmatprep.subr.bf16.mxu0 %v1426_v10 }
 0x59a   : > { %v783_v26 = vpop.permute.xlu1 %782 }
 0x59b   : > { %787 = vst.msk [vmem:[#allocation4 + $0x18] sm:$0xff] %vm754_vm5, %v783_v26  ;;  %v781_v27 = vpop.permute.xlu0 %780 }
 0x59c   : > { %786 = vst.msk [vmem:[#allocation4 + $0x10] sm:$0xff] %vm754_vm5, %v781_v27 }
 0x59e   : > { %v795_v28 = vpop.permute.xlu1 %794 }
 0x59f   : > { %799 = vst.msk [vmem:[#allocation4 + $0x28] sm:$0xff] %vm754_vm5, %v795_v28  ;;  %v793_v29 = vpop.permute.xlu0 %792 }
 0x5a0   : > { %798 = vst.msk [vmem:[#allocation4 + $0x20] sm:$0xff] %vm754_vm5, %v793_v29 }
 0x5a2   : > { %v803_v30 = vld [vmem:[#allocation4 + $0x18] sm:$0xff] }
 0x5a3   : > { %v802_v31 = vld [vmem:[#allocation4 + $0x10] sm:$0xff] }
 0x5a4   : > { %v1218_v32 = vpack.c.bf16 %v803_v30, %v802_v31 }
 0x5a6   : > { %1219 = vmatpush3.bf16.msra.mxu0 %v1218_v32  ;;  %v805_v33 = vld [vmem:[#allocation4 + $0x28] sm:$0xff] }
 0x5a7   : > { %1220 = vmatprep.subr.bf16.mxu0 %v1426_v10  ;;  %v804_v34 = vld [vmem:[#allocation4 + $0x20] sm:$0xff] }
 0x5a8   : > { %v1221_v35 = vpack.c.bf16 %v805_v33, %v804_v34 }
 0x5aa   : > { %1222 = vmatpush3.bf16.msra.mxu0 %v1221_v35 }
 0x5ad   : > { %1184 = vmatmul.mubr.msk.f32.vlgmr.msra.gmra.mrb[2].mxu0 %vm815_vm8, %v770_v36 }
 0x5ae   : > { %1308 = shalt.err (!%p1305_p3)
}
 0x5af   : > { %s1309_s29 = scalar_lea.hbm %s1679_s26, 256  ;;  %s1313_s24 = scalar_lea.hbm %s1783_s8, 512 }
 0x5b0   : > { %p1310_p4 = scmp.ne.s32.totalorder %s1679_s26, %s1309_s29  ;;  %p1314_p9 = scmp.lt.u32.totalorder %s1679_s26, %s1783_s8 }
 0x5b1   : > { %p1315_p10 = scmp.lt.u32.totalorder %s1313_s24, %s1309_s29  ;;  %p1317_p12 = scmp.lt.u32.totalorder %s1309_s29, %s1679_s26 }
 0x5b2   : > { %p1311_p7 = pnand %p1310_p4, %p1532_p5 }
 0x5b3   : > { %p1316_p11 = por %p1315_p10, %p1314_p9 }
 0x5b4   : > { %p1312_p8 = pneg %p1311_p7 }
 0x5b5   : > { %p1318_p13 = por %p1317_p12, %p1316_p11 }
 0x5b7   : > { %p1319_p0 = pnand %p1318_p13, %p1312_p8 }
 0x5b9   : > { %1322 = shalt.err (!%p1319_p0)
}
 0x5ba   : > { %s1435_s15 = smov 128   ;;  %s1436_s18 = smov 8  }
 0x5bb   : > { %1224 = dma.vmem_to_hbm [thread:$0]  (%p1532_p5), %s1672_s30, 256, %s1679_s26, %s1681_s27, %s1435_s15, %s1435_s15, %s1436_s18  }
 0x5bc   : > { %s1092_s10 = sshll.u32 %s1513_s6, 7  ;;  %s914_s28 = sshll.u32 %s1608_s25, 4  ;;  %s915_s28 = int_to_ptr.vmem [resolvable:$true] %s914_s28 }
 0x5bd   : > { %s1709_s29 = scalar_lea.hbm %s1782_s7, %s1092_s10  ;;  %s892_s17 = scalar_lea.sflag [#allocation7], %s1604_s23 }
 0x5be   : > { %s1323_s0 = scalar_lea.vmem %s915_s28, 128  ;;  %s1437_s1 = smov [#allocation6]  }
 0x5bf   : > { %p1324_p1 = scmp.ne.s32.totalorder %s915_s28, %s1323_s0  ;;  %s1327_s2 = sshll.u32 %s1437_s1, 4  ;;  %s1328_s2 = int_to_ptr.vmem [resolvable:$false] %s1327_s2 }
 0x5c0   : > { %s1329_s3 = scalar_lea.vmem %s1328_s2, 256  ;;  %p1330_p4 = scmp.lt.s32.totalorder %s915_s28, %s1328_s2 }
 0x5c1   : > { %p1325_p2 = pnand %p1324_p1, %p1532_p5  ;;  %p1331_p7 = scmp.lt.s32.totalorder %s1329_s3, %s1323_s0 }
 0x5c3   : > { %p1326_p3 = pneg %p1325_p2  ;;  %p1332_p8 = por %p1331_p7, %p1330_p4 }
 0x5c5   : > { %p1333_p9 = pnand %p1332_p8, %p1326_p3 }
 0x5c7   : > { %1336 = shalt.err (!%p1333_p9)
}
 0x5c8   : > { %s1337_s25 = scalar_lea.hbm %s1709_s29, 128  ;;  %s1341_s1 = scalar_lea.hbm %s1782_s7, 256 }
 0x5c9   : > { %p1338_p10 = scmp.ne.s32.totalorder %s1709_s29, %s1337_s25  ;;  %p1342_p13 = scmp.lt.u32.totalorder %s1709_s29, %s1782_s7 }
 0x5ca   : > { %p1343_p0 = scmp.lt.u32.totalorder %s1341_s1, %s1337_s25  ;;  %p1345_p2 = scmp.lt.u32.totalorder %s1337_s25, %s1709_s29 }
 0x5cb   : > { %p1339_p11 = pnand %p1338_p10, %p1532_p5 }
 0x5cc   : > { %p1344_p1 = por %p1343_p0, %p1342_p13 }
 0x5cd   : > { %p1340_p12 = pneg %p1339_p11 }
 0x5ce   : > { %p1346_p3 = por %p1345_p2, %p1344_p1 }
 0x5d0   : > { %p1347_p4 = pnand %p1346_p3, %p1340_p12 }
 0x5d2   : > { %1350 = shalt.err (!%p1347_p4)
}
 0x5d3   : > { %1223 = dma.vmem_to_hbm [thread:$0]  (%p1532_p5), %s915_s28, 128, %s1709_s29, %s892_s17   ;;  %v813_v10 = vsub.s32 0, %v1560_v11  ;;  %v809_v37 = vpop.permute.xlu0 %808  ;;  %vm889_vm9 = vcmask 122880  }
 0x5d4   : > { %s1095_s0 = sshll.u32 %s1513_s6, 4  ;;  %s340_s3 = scalar_lea.vmem [#allocation10], %s1604_s23 }
 0x5d5   : > { %s943_s18 = sshll.u32 %s340_s3, 4  ;;  %v814_v38 = vrot.slane %v809_v37, %v813_v10  ;;  %s1736_s24 = scalar_lea.hbm %s1784_s9, %s1095_s0  ;;  %s944_s18 = int_to_ptr.vmem [resolvable:$true] %s943_s18 }
 0x5d6   : > { %s1351_s29 = scalar_lea.vmem %s944_s18, 16  ;;  %s1438_s6 = smov [#allocation10]  }
 0x5d7   : > { %p1352_p7 = scmp.ne.s32.totalorder %s944_s18, %s1351_s29  ;;  %s1355_s23 = sshll.u32 %s1438_s6, 4  ;;  %s1356_s23 = int_to_ptr.vmem [resolvable:$false] %s1355_s23 }
 0x5d8   : > { %s1357_s28 = scalar_lea.vmem %s1356_s23, 32  ;;  %p1358_p10 = scmp.lt.s32.totalorder %s944_s18, %s1356_s23 }
 0x5d9   : > { %p1353_p8 = pnand %p1352_p7, %p1532_p5  ;;  %p1359_p11 = scmp.lt.s32.totalorder %s1357_s28, %s1351_s29 }
 0x5db   : > { %p1354_p9 = pneg %p1353_p8  ;;  %p1360_p12 = por %p1359_p11, %p1358_p10 }
 0x5dd   : > { %p1361_p13 = pnand %p1360_p12, %p1354_p9 }
 0x680   : > { %v885_v39 = vpop.f32.mrb[2].mxu0 }
 0x681   : > { %v886_v40 = vadd.f32 %v885_v39, %v814_v38  ;;  %v1185_v41 = vpop.f32.mrb[3].mxu0 }
 0x683   : > { %890 = vst.msk [vmem:[%s340_s3] sm:$0x1] %vm889_vm9, %v886_v40 }
 0x684   : > { %1364 = shalt.err (!%p1361_p13)
}
 0x685   : > { %s1365_s17 = scalar_lea.hbm %s1736_s24, 16  ;;  %s1369_s26 = scalar_lea.hbm %s1784_s9, 32 }
 0x686   : > { %p1366_p0 = scmp.ne.s32.totalorder %s1736_s24, %s1365_s17  ;;  %p1370_p3 = scmp.lt.u32.totalorder %s1736_s24, %s1784_s9 }
 0x687   : > { %p1371_p4 = scmp.lt.u32.totalorder %s1369_s26, %s1365_s17  ;;  %p1373_p8 = scmp.lt.u32.totalorder %s1365_s17, %s1736_s24 }
 0x688   : > { %p1367_p1 = pnand %p1366_p0, %p1532_p5 }
 0x689   : > { %p1372_p7 = por %p1371_p4, %p1370_p3 }
 0x68a   : > { %p1368_p2 = pneg %p1367_p1 }
 0x68b   : > { %p1374_p9 = por %p1373_p8, %p1372_p7 }
 0x68d   : > { %p1375_p10 = pnand %p1374_p9, %p1368_p2 }
 0x68f   : > { %1378 = shalt.err (!%p1375_p10)
}
 0x690   : > { %1225 = dma.vmem_to_hbm [thread:$0]  (%p1532_p5), %s944_s18, 16, %s1736_s24, %s1681_s27  }
 0x691 PF: > { %p1239_p11 = scmp.ge.s32.totalorder %s1417_s14, 2  ;;  %s955_s2 = sand.u32 1, %s1405_s11  }
 0x692   : > { %s956_s0 = scalar_lea.sflag [#allocation7], %s955_s2 }
 0x693   : > { %p1230_p12 = pnand %p1239_p11, %p1536_p6 }
 0x695   : > { %1396 = dma.done.wait (!%p1230_p12), %s956_s0, 128  }
 0x696   : > { %1398 = vsyncadd (!%p1230_p12), %s956_s0, 4294967168  ;;  %s1800_s3 = sadd.s32 4294967294, %s1417_s14  }
 0x697   : > { %s964_s10 = sand.u32 1, %s1800_s3  }
 0x698   : > { %s965_s22 = scalar_lea.sflag [#allocation9], %s964_s10 }
 0x699   : > { %1400 = dma.done.wait (!%p1230_p12), %s965_s22, 272  }
 0x69a   : > { %1402 = vsyncadd (!%p1230_p12), %s965_s22, 4294967024  ;;  %p25_p5 = scmp.ge.s32.totalorder %s1517_s16, 4   ;;  %s1801_s11 = smov %s1409_s12 }
 0x69b   : > { %s1802_s12 = smov %s1413_s13  ;;  %s1803_s13 = smov %s1530_s19 }
 0x69c   : > { %s1804_s14 = smov %s1517_s16  ;;  %27 = sbr.rel (!%p25_p5) target bundleno = 10 (0xa), region = 115 }
 0x6a3   :  { %978 = vsyncpa [#allocation7], 1 }
 0x6a4   :  { %980 = vsyncpa [#allocation7 + $0x1], 1 }
 0x6a5   :  { %981 = vsyncpa [#allocation9], 1 }
 0x6a6   :  { %983 = vsyncpa [#allocation9 + $0x1], 1 }

</bundles_post_ra>
